<compile_context>
chip_gen: v7x
topology: tpu7x:2x2x1
jax: 0.10.0
libtpu: 0.0.40
codegen_flags: <defaults>
</compile_context>

<pallas_src>
import jax
import jax.numpy as jnp
from jax import lax
from jax.experimental import pallas as pl
from jax.experimental.pallas import tpu as pltpu

_SEM_POOL = 8          # max in-flight DMAs per grid step
_UNROLL_LIMIT = 16     # fully unroll the channel loop for C <= this


def _gather_dma_kernel(perm_ref, x_hbm, o_hbm, sem):
    """One grid step = one image: C direct HBM->HBM channel copies.

    perm_ref : SMEM int32[B*C]     scalar-prefetched per-image permutations
    x_hbm    : HBM  [B, C, H*W]    raw input ref  (memory_space=pl.ANY)
    o_hbm    : HBM  [B, C, H*W]    raw output ref (memory_space=pl.ANY)
    sem      : DMA semaphores, shape (P,)  rolling pool
    """
    b = pl.program_id(0)
    num_channels = o_hbm.shape[1]     # static Python int
    pool = sem.shape[0]               # static Python int

    def start_copy(c, slot):
        src = x_hbm.at[b, perm_ref[b * num_channels + c]]   # dynamic source channel
        dst = o_hbm.at[b, c]                                 # destination channel
        pltpu.make_async_copy(src, dst, sem.at[slot]).start()

    def wait_copy(c, slot):
        # The wait descriptor only needs the (static) transfer size + semaphore.
        src = x_hbm.at[b, perm_ref[b * num_channels + c]]
        dst = o_hbm.at[b, c]
        pltpu.make_async_copy(src, dst, sem.at[slot]).wait()

    if num_channels <= _UNROLL_LIMIT:
        # Small static C: fully unrolled, rolling semaphore pool.
        for c in range(num_channels):
            if c >= pool:
                wait_copy(c - pool, (c - pool) % pool)
            start_copy(c, c % pool)
        for c in range(max(num_channels - pool, 0), num_channels):
            wait_copy(c, c % pool)
    else:
        # Large C: keep the scalar instruction stream bounded with fori_loops.
        n_warm = min(pool, num_channels)

        def warm(c, carry):
            start_copy(c, c % pool)
            return carry

        def steady(c, carry):
            wait_copy(c - pool, (c - pool) % pool)
            start_copy(c, c % pool)
            return carry

        def drain(c, carry):
            wait_copy(c, c % pool)
            return carry

        lax.fori_loop(0, n_warm, warm, 0, unroll=True)
        lax.fori_loop(n_warm, num_channels, steady, 0)
        lax.fori_loop(num_channels - n_warm, num_channels, drain, 0)


def _batched_permutations(key, batch, channels):
    """One independent uniform random channel permutation per image."""
    keys = jax.random.split(key, batch)
    perm = jax.vmap(lambda k: jax.random.permutation(k, channels))(keys)
    return perm.astype(jnp.int32)   # (B, C)


def random_channel_rearrangement(img: jax.Array, key: jax.Array) -> jax.Array:
    """Randomly permutes the channel axis of a (C,H,W) or (B,C,H,W) image."""
    squeeze = False
    if img.ndim == 3:               # single image, as in the PyTorch module
        img = img[None]
        squeeze = True
    if img.ndim != 4:
        raise ValueError(f"expected (C,H,W) or (B,C,H,W) image, got {img.shape}")
    B, C, H, W = img.shape

    # TODO(synk): Python's global `random.shuffle` RNG state has no JAX
    # equivalent; an explicit jax.random key drives the permutation instead.
    perm = _batched_permutations(key, B, C).reshape(-1)   # flat (B*C,) for SMEM

    # Flatten each channel to a contiguous 1-D slab -> one contiguous DMA per
    # channel (keeps every HBM burst large even when W is narrow).
    x_flat = img.reshape(B, C, H * W)

    pool = min(C, _SEM_POOL)
    bytes_moved = 2 * img.size * jnp.dtype(img.dtype).itemsize   # read + write

    grid_spec = pltpu.PrefetchScalarGridSpec(
        num_scalar_prefetch=1,                        # perm lives in SMEM
        grid=(B,),                                    # one grid step per image
        in_specs=[pl.BlockSpec(memory_space=pl.ANY)],     # raw HBM input ref
        out_specs=pl.BlockSpec(memory_space=pl.ANY),      # raw HBM output ref
        scratch_shapes=[pltpu.SemaphoreType.DMA((pool,))],
    )

    out_flat = pl.pallas_call(
        _gather_dma_kernel,
        out_shape=jax.ShapeDtypeStruct((B, C, H * W), img.dtype),
        grid_spec=grid_spec,
        compiler_params=pltpu.CompilerParams(
            # Batch images are independent; on v7x the two TensorCores each
            # handle half of them. No effect on single-TC v5e/v6e.
            dimension_semantics=("parallel",),
        ),
        cost_estimate=pl.CostEstimate(
            flops=0, transcendentals=0, bytes_accessed=int(bytes_moved)
        ),
    )(perm, x_flat)

    out = out_flat.reshape(B, C, H, W)
    if squeeze:
        out = out[0]
    return out


if __name__ == "__main__":
    key = jax.random.PRNGKey(0)
    k_img, k_perm = jax.random.split(key)

    # Small batched CHW input consistent with the module's dim=0 channel split.
    B, C, H, W = 2, 4, 16, 16
    img = jax.random.normal(k_img, (B, C, H, W), dtype=jnp.float32)

    out = jax.block_until_ready(random_channel_rearrangement(img, k_perm))

    # Verify against a plain-JAX gather using the same per-image permutations.
    perm = _batched_permutations(k_perm, B, C)
    ref = jax.vmap(lambda x, p: x[p])(img, perm)

    assert out.shape == img.shape and out.dtype == img.dtype
    assert bool(jnp.allclose(out, ref)), "Pallas output mismatch vs reference"

    print("KERNEL_OK")
</pallas_src>

<mosaic_0001>
module attributes {stable_mosaic.version = 11 : i64} {
  func.func @_gather_dma_kernel(%arg0: i32, %arg1: memref<8xi32, #tpu.memory_space<smem>>, %arg2: memref<2x4x256xf32, #tpu.memory_space<any>>, %arg3: memref<2x4x256xf32, #tpu.memory_space<any>>, %arg4: memref<4x!tpu.dma_semaphore, #tpu.memory_space<semaphore_mem>>) attributes {dimension_semantics = [#tpu.dimension_semantics<parallel>], iteration_bounds = array<i64: 2>, scalar_prefetch = 1 : i64, scratch_operands = 1 : i64, tpu.core_type = #tpu.core_type<tc>, window_params = [{}, {}]} {
    %c4_i32 = arith.constant 4 : i32
    %0 = arith.muli %arg0, %c4_i32 : i32
    %c0_i32 = arith.constant 0 : i32
    %1 = arith.addi %0, %c0_i32 : i32
    %2 = arith.index_cast %1 : i32 to index
    %3 = memref.load %arg1[%2] : memref<8xi32, #tpu.memory_space<smem>>
    %c0_i32_0 = arith.constant 0 : i32
    %c0_i32_1 = arith.constant 0 : i32
    %c0_i32_2 = arith.constant 0 : i32
    %4 = tpu.memref_slice %arg2[%arg0, %3, %c0_i32_2] : memref<2x4x256xf32, #tpu.memory_space<any>> -> memref<1x1x256xf32, #tpu.memory_space<any>>
    %5 = tpu.memref_squeeze %4 : memref<1x1x256xf32, #tpu.memory_space<any>> -> memref<256xf32, #tpu.memory_space<any>>
    %c0_i32_3 = arith.constant 0 : i32
    %6 = tpu.memref_slice %arg3[%arg0, %c0_i32_0, %c0_i32_3] : memref<2x4x256xf32, #tpu.memory_space<any>> -> memref<1x1x256xf32, #tpu.memory_space<any>>
    %7 = tpu.memref_squeeze %6 : memref<1x1x256xf32, #tpu.memory_space<any>> -> memref<256xf32, #tpu.memory_space<any>>
    %8 = tpu.memref_slice %arg4[%c0_i32_1] : memref<4x!tpu.dma_semaphore, #tpu.memory_space<semaphore_mem>> -> memref<1x!tpu.dma_semaphore, #tpu.memory_space<semaphore_mem>>
    %9 = tpu.memref_squeeze %8 : memref<1x!tpu.dma_semaphore, #tpu.memory_space<semaphore_mem>> -> memref<!tpu.dma_semaphore, #tpu.memory_space<semaphore_mem>>
    tpu.enqueue_dma source(%5 : memref<256xf32, #tpu.memory_space<any>>) target(%7 : memref<256xf32, #tpu.memory_space<any>>) target_semaphore(%9 : memref<!tpu.dma_semaphore, #tpu.memory_space<semaphore_mem>>)
    %c4_i32_4 = arith.constant 4 : i32
    %10 = arith.muli %arg0, %c4_i32_4 : i32
    %c1_i32 = arith.constant 1 : i32
    %11 = arith.addi %10, %c1_i32 : i32
    %12 = arith.index_cast %11 : i32 to index
    %13 = memref.load %arg1[%12] : memref<8xi32, #tpu.memory_space<smem>>
    %c1_i32_5 = arith.constant 1 : i32
    %c1_i32_6 = arith.constant 1 : i32
    %c0_i32_7 = arith.constant 0 : i32
    %14 = tpu.memref_slice %arg2[%arg0, %13, %c0_i32_7] : memref<2x4x256xf32, #tpu.memory_space<any>> -> memref<1x1x256xf32, #tpu.memory_space<any>>
    %15 = tpu.memref_squeeze %14 : memref<1x1x256xf32, #tpu.memory_space<any>> -> memref<256xf32, #tpu.memory_space<any>>
    %c0_i32_8 = arith.constant 0 : i32
    %16 = tpu.memref_slice %arg3[%arg0, %c1_i32_5, %c0_i32_8] : memref<2x4x256xf32, #tpu.memory_space<any>> -> memref<1x1x256xf32, #tpu.memory_space<any>>
    %17 = tpu.memref_squeeze %16 : memref<1x1x256xf32, #tpu.memory_space<any>> -> memref<256xf32, #tpu.memory_space<any>>
    %18 = tpu.memref_slice %arg4[%c1_i32_6] : memref<4x!tpu.dma_semaphore, #tpu.memory_space<semaphore_mem>> -> memref<1x!tpu.dma_semaphore, #tpu.memory_space<semaphore_mem>>
    %19 = tpu.memref_squeeze %18 : memref<1x!tpu.dma_semaphore, #tpu.memory_space<semaphore_mem>> -> memref<!tpu.dma_semaphore, #tpu.memory_space<semaphore_mem>>
    tpu.enqueue_dma source(%15 : memref<256xf32, #tpu.memory_space<any>>) target(%17 : memref<256xf32, #tpu.memory_space<any>>) target_semaphore(%19 : memref<!tpu.dma_semaphore, #tpu.memory_space<semaphore_mem>>)
    %c4_i32_9 = arith.constant 4 : i32
    %20 = arith.muli %arg0, %c4_i32_9 : i32
    %c2_i32 = arith.constant 2 : i32
    %21 = arith.addi %20, %c2_i32 : i32
    %22 = arith.index_cast %21 : i32 to index
    %23 = memref.load %arg1[%22] : memref<8xi32, #tpu.memory_space<smem>>
    %c2_i32_10 = arith.constant 2 : i32
    %c2_i32_11 = arith.constant 2 : i32
    %c0_i32_12 = arith.constant 0 : i32
    %24 = tpu.memref_slice %arg2[%arg0, %23, %c0_i32_12] : memref<2x4x256xf32, #tpu.memory_space<any>> -> memref<1x1x256xf32, #tpu.memory_space<any>>
    %25 = tpu.memref_squeeze %24 : memref<1x1x256xf32, #tpu.memory_space<any>> -> memref<256xf32, #tpu.memory_space<any>>
    %c0_i32_13 = arith.constant 0 : i32
    %26 = tpu.memref_slice %arg3[%arg0, %c2_i32_10, %c0_i32_13] : memref<2x4x256xf32, #tpu.memory_space<any>> -> memref<1x1x256xf32, #tpu.memory_space<any>>
    %27 = tpu.memref_squeeze %26 : memref<1x1x256xf32, #tpu.memory_space<any>> -> memref<256xf32, #tpu.memory_space<any>>
    %28 = tpu.memref_slice %arg4[%c2_i32_11] : memref<4x!tpu.dma_semaphore, #tpu.memory_space<semaphore_mem>> -> memref<1x!tpu.dma_semaphore, #tpu.memory_space<semaphore_mem>>
    %29 = tpu.memref_squeeze %28 : memref<1x!tpu.dma_semaphore, #tpu.memory_space<semaphore_mem>> -> memref<!tpu.dma_semaphore, #tpu.memory_space<semaphore_mem>>
    tpu.enqueue_dma source(%25 : memref<256xf32, #tpu.memory_space<any>>) target(%27 : memref<256xf32, #tpu.memory_space<any>>) target_semaphore(%29 : memref<!tpu.dma_semaphore, #tpu.memory_space<semaphore_mem>>)
    %c4_i32_14 = arith.constant 4 : i32
    %30 = arith.muli %arg0, %c4_i32_14 : i32
    %c3_i32 = arith.constant 3 : i32
    %31 = arith.addi %30, %c3_i32 : i32
    %32 = arith.index_cast %31 : i32 to index
    %33 = memref.load %arg1[%32] : memref<8xi32, #tpu.memory_space<smem>>
    %c3_i32_15 = arith.constant 3 : i32
    %c3_i32_16 = arith.constant 3 : i32
    %c0_i32_17 = arith.constant 0 : i32
    %34 = tpu.memref_slice %arg2[%arg0, %33, %c0_i32_17] : memref<2x4x256xf32, #tpu.memory_space<any>> -> memref<1x1x256xf32, #tpu.memory_space<any>>
    %35 = tpu.memref_squeeze %34 : memref<1x1x256xf32, #tpu.memory_space<any>> -> memref<256xf32, #tpu.memory_space<any>>
    %c0_i32_18 = arith.constant 0 : i32
    %36 = tpu.memref_slice %arg3[%arg0, %c3_i32_15, %c0_i32_18] : memref<2x4x256xf32, #tpu.memory_space<any>> -> memref<1x1x256xf32, #tpu.memory_space<any>>
    %37 = tpu.memref_squeeze %36 : memref<1x1x256xf32, #tpu.memory_space<any>> -> memref<256xf32, #tpu.memory_space<any>>
    %38 = tpu.memref_slice %arg4[%c3_i32_16] : memref<4x!tpu.dma_semaphore, #tpu.memory_space<semaphore_mem>> -> memref<1x!tpu.dma_semaphore, #tpu.memory_space<semaphore_mem>>
    %39 = tpu.memref_squeeze %38 : memref<1x!tpu.dma_semaphore, #tpu.memory_space<semaphore_mem>> -> memref<!tpu.dma_semaphore, #tpu.memory_space<semaphore_mem>>
    tpu.enqueue_dma source(%35 : memref<256xf32, #tpu.memory_space<any>>) target(%37 : memref<256xf32, #tpu.memory_space<any>>) target_semaphore(%39 : memref<!tpu.dma_semaphore, #tpu.memory_space<semaphore_mem>>)
    %c4_i32_19 = arith.constant 4 : i32
    %40 = arith.muli %arg0, %c4_i32_19 : i32
    %c0_i32_20 = arith.constant 0 : i32
    %41 = arith.addi %40, %c0_i32_20 : i32
    %42 = arith.index_cast %41 : i32 to index
    %43 = memref.load %arg1[%42] : memref<8xi32, #tpu.memory_space<smem>>
    %c0_i32_21 = arith.constant 0 : i32
    %c0_i32_22 = arith.constant 0 : i32
    %c0_i32_23 = arith.constant 0 : i32
    %44 = tpu.memref_slice %arg2[%arg0, %43, %c0_i32_23] : memref<2x4x256xf32, #tpu.memory_space<any>> -> memref<1x1x256xf32, #tpu.memory_space<any>>
    %45 = tpu.memref_squeeze %44 : memref<1x1x256xf32, #tpu.memory_space<any>> -> memref<256xf32, #tpu.memory_space<any>>
    %c0_i32_24 = arith.constant 0 : i32
    %46 = tpu.memref_slice %arg3[%arg0, %c0_i32_21, %c0_i32_24] : memref<2x4x256xf32, #tpu.memory_space<any>> -> memref<1x1x256xf32, #tpu.memory_space<any>>
    %47 = tpu.memref_squeeze %46 : memref<1x1x256xf32, #tpu.memory_space<any>> -> memref<256xf32, #tpu.memory_space<any>>
    %48 = tpu.memref_slice %arg4[%c0_i32_22] : memref<4x!tpu.dma_semaphore, #tpu.memory_space<semaphore_mem>> -> memref<1x!tpu.dma_semaphore, #tpu.memory_space<semaphore_mem>>
    %49 = tpu.memref_squeeze %48 : memref<1x!tpu.dma_semaphore, #tpu.memory_space<semaphore_mem>> -> memref<!tpu.dma_semaphore, #tpu.memory_space<semaphore_mem>>
    tpu.wait_dma2 semaphore(%49 : memref<!tpu.dma_semaphore, #tpu.memory_space<semaphore_mem>>) src(%45 : memref<256xf32, #tpu.memory_space<any>>) dst(%47 : memref<256xf32, #tpu.memory_space<any>>)
    %c4_i32_25 = arith.constant 4 : i32
    %50 = arith.muli %arg0, %c4_i32_25 : i32
    %c1_i32_26 = arith.constant 1 : i32
    %51 = arith.addi %50, %c1_i32_26 : i32
    %52 = arith.index_cast %51 : i32 to index
    %53 = memref.load %arg1[%52] : memref<8xi32, #tpu.memory_space<smem>>
    %c1_i32_27 = arith.constant 1 : i32
    %c1_i32_28 = arith.constant 1 : i32
    %c0_i32_29 = arith.constant 0 : i32
    %54 = tpu.memref_slice %arg2[%arg0, %53, %c0_i32_29] : memref<2x4x256xf32, #tpu.memory_space<any>> -> memref<1x1x256xf32, #tpu.memory_space<any>>
    %55 = tpu.memref_squeeze %54 : memref<1x1x256xf32, #tpu.memory_space<any>> -> memref<256xf32, #tpu.memory_space<any>>
    %c0_i32_30 = arith.constant 0 : i32
    %56 = tpu.memref_slice %arg3[%arg0, %c1_i32_27, %c0_i32_30] : memref<2x4x256xf32, #tpu.memory_space<any>> -> memref<1x1x256xf32, #tpu.memory_space<any>>
    %57 = tpu.memref_squeeze %56 : memref<1x1x256xf32, #tpu.memory_space<any>> -> memref<256xf32, #tpu.memory_space<any>>
    %58 = tpu.memref_slice %arg4[%c1_i32_28] : memref<4x!tpu.dma_semaphore, #tpu.memory_space<semaphore_mem>> -> memref<1x!tpu.dma_semaphore, #tpu.memory_space<semaphore_mem>>
    %59 = tpu.memref_squeeze %58 : memref<1x!tpu.dma_semaphore, #tpu.memory_space<semaphore_mem>> -> memref<!tpu.dma_semaphore, #tpu.memory_space<semaphore_mem>>
    tpu.wait_dma2 semaphore(%59 : memref<!tpu.dma_semaphore, #tpu.memory_space<semaphore_mem>>) src(%55 : memref<256xf32, #tpu.memory_space<any>>) dst(%57 : memref<256xf32, #tpu.memory_space<any>>)
    %c4_i32_31 = arith.constant 4 : i32
    %60 = arith.muli %arg0, %c4_i32_31 : i32
    %c2_i32_32 = arith.constant 2 : i32
    %61 = arith.addi %60, %c2_i32_32 : i32
    %62 = arith.index_cast %61 : i32 to index
    %63 = memref.load %arg1[%62] : memref<8xi32, #tpu.memory_space<smem>>
    %c2_i32_33 = arith.constant 2 : i32
    %c2_i32_34 = arith.constant 2 : i32
    %c0_i32_35 = arith.constant 0 : i32
    %64 = tpu.memref_slice %arg2[%arg0, %63, %c0_i32_35] : memref<2x4x256xf32, #tpu.memory_space<any>> -> memref<1x1x256xf32, #tpu.memory_space<any>>
    %65 = tpu.memref_squeeze %64 : memref<1x1x256xf32, #tpu.memory_space<any>> -> memref<256xf32, #tpu.memory_space<any>>
    %c0_i32_36 = arith.constant 0 : i32
    %66 = tpu.memref_slice %arg3[%arg0, %c2_i32_33, %c0_i32_36] : memref<2x4x256xf32, #tpu.memory_space<any>> -> memref<1x1x256xf32, #tpu.memory_space<any>>
    %67 = tpu.memref_squeeze %66 : memref<1x1x256xf32, #tpu.memory_space<any>> -> memref<256xf32, #tpu.memory_space<any>>
    %68 = tpu.memref_slice %arg4[%c2_i32_34] : memref<4x!tpu.dma_semaphore, #tpu.memory_space<semaphore_mem>> -> memref<1x!tpu.dma_semaphore, #tpu.memory_space<semaphore_mem>>
    %69 = tpu.memref_squeeze %68 : memref<1x!tpu.dma_semaphore, #tpu.memory_space<semaphore_mem>> -> memref<!tpu.dma_semaphore, #tpu.memory_space<semaphore_mem>>
    tpu.wait_dma2 semaphore(%69 : memref<!tpu.dma_semaphore, #tpu.memory_space<semaphore_mem>>) src(%65 : memref<256xf32, #tpu.memory_space<any>>) dst(%67 : memref<256xf32, #tpu.memory_space<any>>)
    %c4_i32_37 = arith.constant 4 : i32
    %70 = arith.muli %arg0, %c4_i32_37 : i32
    %c3_i32_38 = arith.constant 3 : i32
    %71 = arith.addi %70, %c3_i32_38 : i32
    %72 = arith.index_cast %71 : i32 to index
    %73 = memref.load %arg1[%72] : memref<8xi32, #tpu.memory_space<smem>>
    %c3_i32_39 = arith.constant 3 : i32
    %c3_i32_40 = arith.constant 3 : i32
    %c0_i32_41 = arith.constant 0 : i32
    %74 = tpu.memref_slice %arg2[%arg0, %73, %c0_i32_41] : memref<2x4x256xf32, #tpu.memory_space<any>> -> memref<1x1x256xf32, #tpu.memory_space<any>>
    %75 = tpu.memref_squeeze %74 : memref<1x1x256xf32, #tpu.memory_space<any>> -> memref<256xf32, #tpu.memory_space<any>>
    %c0_i32_42 = arith.constant 0 : i32
    %76 = tpu.memref_slice %arg3[%arg0, %c3_i32_39, %c0_i32_42] : memref<2x4x256xf32, #tpu.memory_space<any>> -> memref<1x1x256xf32, #tpu.memory_space<any>>
    %77 = tpu.memref_squeeze %76 : memref<1x1x256xf32, #tpu.memory_space<any>> -> memref<256xf32, #tpu.memory_space<any>>
    %78 = tpu.memref_slice %arg4[%c3_i32_40] : memref<4x!tpu.dma_semaphore, #tpu.memory_space<semaphore_mem>> -> memref<1x!tpu.dma_semaphore, #tpu.memory_space<semaphore_mem>>
    %79 = tpu.memref_squeeze %78 : memref<1x!tpu.dma_semaphore, #tpu.memory_space<semaphore_mem>> -> memref<!tpu.dma_semaphore, #tpu.memory_space<semaphore_mem>>
    tpu.wait_dma2 semaphore(%79 : memref<!tpu.dma_semaphore, #tpu.memory_space<semaphore_mem>>) src(%75 : memref<256xf32, #tpu.memory_space<any>>) dst(%77 : memref<256xf32, #tpu.memory_space<any>>)
    return
  }
}

</mosaic_0001>

<bundles_post_ra>
// kernel: tpu_custom_call.1
= control target key start
LH: loop header
LB: loop body
LE: loop exit
PB: predicated region body
PF: predicated region fallthrough
CT: control target
= control target key end

     0   :  { %s399_s0 = inlined_call_operand.hbm [shape: s32[8], index: 0, kind: input, shape index: {}]   ;;  %s400_s1 = inlined_call_operand.hbm [shape: f32[2,4,256], index: 1, kind: input, shape index: {}]   ;;  %s401_s2 = inlined_call_operand.hbm [shape: f32[2,4,256], index: 2, kind: output, shape index: {}]  }
   0x1   :  { %s272_s11 = scalar_lea.hbm %s399_s0, 16 }
   0x2   :  { %p273_p0 = scmp.ne.s32.totalorder %s399_s0, %s272_s11  ;;  %p276_p1 = scmp.lt.u32.totalorder %s272_s11, %s399_s0 }
   0x4   :  { %p278_p2 = pnand %p276_p1, %p273_p0 }
   0x6   :  { %281 = shalt.err (!%p278_p2)  }
   0x7   :  { %s300_s16 = smov [#allocation4]  }
   0x8   :  { %8 = dma.hbm_to_smem %s399_s0, 16, %s300_s16, [#allocation3] }
   0x9   :  { %286 = dma.done.wait [#allocation3], 16 }
   0xa   :  { %287 = vsyncadd [#allocation3], 4294967280 }
   0xb   :  { %10 = sfence }
   0xc   :  { %s339_s19 = smov 0  }
   0xd LB: > { %s345_s20 = sshll.u32 %s298_s19, 2  ;;  %s248_s22 = sshll.u32 %s298_s19, 7  ;;  %s298_s19 = sphi %s339_s19, %s16_s19  }
   0xe   : > { %s19_s21 = sld [smem:[#allocation4 + %s345_s20]]  ;;  %s301_s0 = smov 64  }
   0xf   : > { %42 = sst [smem:[#allocation6]] %s301_s0  ;;  %s302_s23 = smov 1  }
  0x10   : > { %44 = sst [smem:[#allocation6 + $0x1]] %s301_s0  ;;  %s353_s24 = sshll.u32 %s298_s19, 3 }
  0x11   : > { %46 = sst [smem:[#allocation6 + $0x2]] %s302_s23  ;;  %s358_s27 = scalar_lea.hbm %s401_s2, %s248_s22 }
  0x12   : > { %s49_s6 = sadd.s32 1, %s345_s20  ;;  %s303_s10 = smov [#allocation2]  }
  0x13   : > { %s304_s11 = smov [#allocation5]   ;;  %s305_s12 = smov 0  }
  0x14   : > { %s20_s28 = sshrl.u32 %s19_s21, 2  ;;  %s21_s29 = sand.u32 3, %s19_s21  }
  0x15   : > { %s228_s30 = sshll.u32 %s20_s28, 3  ;;  %s201_s17 = scalar_lea.hbm %s358_s27, 16 }
  0x16   : > { %s23_s3 = sadd.s32 %s228_s30, %s21_s29  ;;  %s81_s25 = sadd.s32 2, %s345_s20 }
  0x17   : > { %s25_s4 = sadd.s32 %s353_s24, %s23_s3  ;;  %s306_s30 = smov [#allocation2 + $0x1]  }
  0x18   : > { %s230_s5 = sshll.u32 %s25_s4, 4  ;;  %s307_s3 = smov [#allocation7]  }
  0x19   : > { %s27_s9 = scalar_lea.hbm %s400_s1, %s230_s5  ;;  %s211_s7 = scalar_lea.hbm %s358_s27, 32 }
  0x1a   : > { %48 = dma.general %s27_s9, 32, %s358_s27, %s303_s10, %s304_s11, [#allocation6], %s305_s12, 0  }
  0x1b   : > { %s50_s13 = sld [smem:[#allocation4 + %s49_s6]]  ;;  %s221_s26 = scalar_lea.hbm %s358_s27, 48 }
  0x1c   : > { %74 = sst [smem:[#allocation8]] %s301_s0 }
  0x1d   : > { %76 = sst [smem:[#allocation8 + $0x1]] %s301_s0 }
  0x1e   : > { %78 = sst [smem:[#allocation8 + $0x2]] %s302_s23 }
  0x21   : > { %s51_s14 = sshrl.u32 %s50_s13, 2  ;;  %s52_s15 = sand.u32 3, %s50_s13  }
  0x22   : > { %s232_s16 = sshll.u32 %s51_s14, 3  ;;  %s113_s13 = sadd.s32 3, %s345_s20 }
  0x23   : > { %s54_s18 = sadd.s32 %s232_s16, %s52_s15 }
  0x24   : > { %s55_s21 = sadd.s32 %s353_s24, %s54_s18  ;;  %s309_s18 = smov [#allocation9]  }
  0x25   : > { %s233_s22 = sshll.u32 %s55_s21, 4 }
  0x26   : > { %s57_s29 = scalar_lea.hbm %s400_s1, %s233_s22 }
  0x27   : > { %80 = dma.general %s57_s29, 32, %s201_s17, %s306_s30, %s307_s3, [#allocation8], %s305_s12, 0  }
  0x28   : > { %s82_s4 = sld [smem:[#allocation4 + %s81_s25]]  ;;  %s308_s17 = smov [#allocation2 + $0x2]  }
  0x29   : > { %106 = sst [smem:[#allocation10]] %s301_s0 }
  0x2a   : > { %108 = sst [smem:[#allocation10 + $0x1]] %s301_s0 }
  0x2b   : > { %110 = sst [smem:[#allocation10 + $0x2]] %s302_s23 }
  0x2e   : > { %s83_s5 = sshrl.u32 %s82_s4, 2  ;;  %s84_s6 = sand.u32 3, %s82_s4  }
  0x2f   : > { %s236_s8 = sshll.u32 %s83_s5, 3 }
  0x30   : > { %s86_s9 = sadd.s32 %s236_s8, %s84_s6  ;;  %s310_s6 = smov [#allocation2 + $0x3]  }
  0x31   : > { %s87_s10 = sadd.s32 %s353_s24, %s86_s9 }
  0x32   : > { %s237_s11 = sshll.u32 %s87_s10, 4 }
  0x33   : > { %s89_s16 = scalar_lea.hbm %s400_s1, %s237_s11 }
  0x34   : > { %112 = dma.general %s89_s16, 32, %s211_s7, %s308_s17, %s309_s18, [#allocation10], %s305_s12, 0  }
  0x35   : > { %s114_s21 = sld [smem:[#allocation4 + %s113_s13]]  ;;  %s311_s7 = smov [#allocation11]  }
  0x36   : > { %138 = sst [smem:[#allocation12]] %s301_s0 }
  0x37   : > { %140 = sst [smem:[#allocation12 + $0x1]] %s301_s0 }
  0x38   : > { %142 = sst [smem:[#allocation12 + $0x2]] %s302_s23 }
  0x3b   : > { %s115_s22 = sshrl.u32 %s114_s21, 2  ;;  %s116_s25 = sand.u32 3, %s114_s21  }
  0x3c   : > { %s240_s28 = sshll.u32 %s115_s22, 3 }
  0x3d   : > { %s118_s20 = sadd.s32 %s240_s28, %s116_s25 }
  0x3e   : > { %s119_s29 = sadd.s32 %s353_s24, %s118_s20 }
  0x3f   : > { %s241_s30 = sshll.u32 %s119_s29, 4 }
  0x40   : > { %s121_s5 = scalar_lea.hbm %s400_s1, %s241_s30 }
  0x41   : > { %144 = dma.general %s121_s5, 32, %s221_s26, %s310_s6, %s311_s7, [#allocation12], %s305_s12, 0  }
  0x42   : > { %288 = dma.done.wait [#allocation2], 32 }
  0x43   : > { %289 = vsyncadd [#allocation2], 4294967264 }
  0x44   : > { %290 = dma.done.wait [#allocation2 + $0x1], 32 }
  0x45   : > { %291 = vsyncadd [#allocation2 + $0x1], 4294967264 }
  0x46   : > { %292 = dma.done.wait [#allocation2 + $0x2], 32 }
  0x47   : > { %293 = vsyncadd [#allocation2 + $0x2], 4294967264 }
  0x48   : > { %294 = dma.done.wait [#allocation2 + $0x3], 32 }
  0x49   : > { %295 = vsyncadd [#allocation2 + $0x3], 4294967264  ;;  %s16_s19 = sadd.s32 1, %s298_s19  }
  0x4a   : > { %p13_p3 = scmp.ge.s32.totalorder %s16_s19, 2  }
  0x4c   :  { %15 = sbr.rel (!%p13_p3) target bundleno = 13 (0xd), region = 41 }
  0x53   :  { %157 = vsyncmov [#allocation2] }
  0x56   :  { %s158_s0 = vpop.sfrf %157 }
  0x57   :  { %p244_p4 = scmp.ne.s32.totalorder %s158_s0, 0 }
  0x59   :  { %162 = shalt.err (%p244_p4)  }
  0x5a   :  { %164 = vsyncmov [#allocation2 + $0x1] }
  0x5d   :  { %s165_s23 = vpop.sfrf %164 }
  0x5e   :  { %p245_p5 = scmp.ne.s32.totalorder %s165_s23, 0 }
  0x60   :  { %169 = shalt.err (%p245_p5)  }
  0x61   :  { %171 = vsyncmov [#allocation2 + $0x2] }
  0x64   :  { %s172_s24 = vpop.sfrf %171 }
  0x65   :  { %p246_p6 = scmp.ne.s32.totalorder %s172_s24, 0 }
  0x67   :  { %176 = shalt.err (%p246_p6)  }
  0x68   :  { %178 = vsyncmov [#allocation2 + $0x3] }
  0x6b   :  { %s179_s27 = vpop.sfrf %178 }
  0x6c   :  { %p247_p7 = scmp.ne.s32.totalorder %s179_s27, 0 }
  0x6e   :  { %183 = shalt.err (%p247_p7)  }

</bundles_post_ra>
